<compile_context>
chip_gen: v7x
topology: tpu7x:2x2x1
jax: 0.10.0
libtpu: 0.0.40
codegen_flags: <defaults>
</compile_context>

<pallas_src>
import functools

import jax
import jax.numpy as jnp
from jax.experimental import pallas as pl
from jax.experimental.pallas import tpu as pltpu

EPS = 1e-12  # kept only in the reference; a no-op on f32 logits


def _ce_loss_kernel(pred_ref, tgt_ref, out_ref, sumexp_ref, picked_ref, *,
                    total_n, total_m, tile_n, tile_m, mask_rows, mask_cols):
    i = pl.program_id(0)   # row-tile index   ("parallel")
    j = pl.program_id(1)   # M-chunk index    ("arbitrary" reduction)

    @pl.when(j == 0)
    def _():
        sumexp_ref[...] = jnp.zeros_like(sumexp_ref)
        picked_ref[...] = jnp.zeros_like(picked_ref)

    pred = pred_ref[...]          # (tile_n, tile_m), native dtype
    tgt = tgt_ref[...]            # (tile_n, 1) int32

    # Global column indices of this M chunk.
    col = jax.lax.broadcasted_iota(jnp.int32, pred.shape, 1) + j * tile_m

    # Gather pred[r, target[r]] for targets falling inside this chunk
    # (one-hot select; no dynamic gather on TPU). Accumulate in f32.
    hit = jnp.where(col == tgt, pred, jnp.zeros_like(pred))
    picked_ref[...] += jnp.sum(hit.astype(jnp.float32), axis=1, keepdims=True)

    # Online sum of exp(pred) across M chunks (matches torch: no max-subtraction).
    e = jnp.exp(pred)
    if mask_cols:  # static flag: only emitted when M was padded
        e = jnp.where(col < total_m, e, jnp.zeros_like(e))
    sumexp_ref[...] += jnp.sum(e.astype(jnp.float32), axis=1, keepdims=True)

    # Finalize per-row losses on the last M chunk; the resident output block is
    # only written back to HBM when the row-tile index changes.
    @pl.when(j == pl.num_programs(1) - 1)
    def _():
        loss = -picked_ref[...] + jnp.log(sumexp_ref[...])       # (tile_n, 1)
        if mask_rows:  # static flag: only emitted when N was padded
            row = jax.lax.broadcasted_iota(jnp.int32, (tile_n, 1), 0) + i * tile_n
            loss = jnp.where(row < total_n, loss, 0.0)
        out_ref[...] = loss


def ce_loss(pred, target, *, tile_n=None, tile_m=None):
    """pred: [N, M] float, target: [N] int -> scalar mean CE loss (f32)."""
    N, M = pred.shape
    dt_size = jnp.dtype(pred.dtype).itemsize

    # ---- tile selection -----------------------------------------------------
    # M chunk: full row if small, else a lane-dense multiple of 128.
    if tile_m is None:
        tile_m = M if M <= 2048 else 1024
    # Row tile: biggest multiple of 8 such that one pred buffer stays ~<= 8 MiB
    # (2x double-buffered => <= 16 MiB, safe on v5e/v6e/v7x VMEM budgets).
    if tile_n is None:
        per_buf_budget = 8 * 1024 * 1024
        tile_n = per_buf_budget // (tile_m * dt_size)
        tile_n = max(8, min(2048, (tile_n // 8) * 8))
    tile_n = min(tile_n, pl.cdiv(N, 8) * 8)   # don't tile past (padded) N
    tile_n = max(8, (tile_n // 8) * 8)

    # ---- pad to tile multiples (padded rows/cols are masked in-kernel) ------
    n_pad = pl.cdiv(N, tile_n) * tile_n
    m_pad = pl.cdiv(M, tile_m) * tile_m
    pred_p = pred
    if (n_pad, m_pad) != (N, M):
        pred_p = jnp.pad(pred, ((0, n_pad - N), (0, m_pad - M)))
    tgt_p = jnp.pad(target.astype(jnp.int32), (0, n_pad - N)).reshape(n_pad, 1)

    grid = (n_pad // tile_n, m_pad // tile_m)

    kernel = functools.partial(
        _ce_loss_kernel,
        total_n=N, total_m=M, tile_n=tile_n, tile_m=tile_m,
        mask_rows=(n_pad != N), mask_cols=(m_pad != M),
    )

    # Explicit scoped-VMEM limit (never rely on the 16/32 MiB defaults), with
    # headroom, capped below v7x's 64 MiB physical VMEM per TensorCore.
    vmem_limit = 2 * tile_n * tile_m * dt_size       # double-buffered pred
    vmem_limit += 6 * tile_n * 128 * 4               # tgt / out / scratch (lane-padded)
    vmem_limit = max(32 * 1024 * 1024, min(64 * 1024 * 1024,
                                           vmem_limit + 4 * 1024 * 1024))

    cost = pl.CostEstimate(
        flops=5 * N * M,                              # select/compare/add/sum work
        transcendentals=N * M + N,                    # exp per element + log per row
        bytes_accessed=N * M * dt_size + N * 4 + n_pad * 4,
    )

    per_row = pl.pallas_call(
        kernel,
        out_shape=jax.ShapeDtypeStruct((n_pad, 1), jnp.float32),
        grid_spec=pltpu.PrefetchScalarGridSpec(
            num_scalar_prefetch=0,
            grid=grid,
            in_specs=[
                pl.BlockSpec((tile_n, tile_m), lambda i, j: (i, j)),
                # target block: independent of the M axis -> DMA'd once per row tile
                pl.BlockSpec((tile_n, 1), lambda i, j: (i, 0)),
            ],
            out_specs=pl.BlockSpec((tile_n, 1), lambda i, j: (i, 0)),
            scratch_shapes=[
                pltpu.VMEM((tile_n, 1), jnp.float32),   # running sum of exp
                pltpu.VMEM((tile_n, 1), jnp.float32),   # running picked value
            ],
        ),
        compiler_params=pltpu.CompilerParams(
            dimension_semantics=("parallel", "arbitrary"),
            vmem_limit_bytes=int(vmem_limit),
        ),
        cost_estimate=cost,
    )(pred_p, tgt_p)

    return jnp.sum(per_row) / jnp.float32(N)


def ce_loss_ref(pred, target):
    # Faithful to the torch module (including the eps inside exp).
    picked = jnp.take_along_axis(pred, target[:, None].astype(jnp.int32), axis=1)[:, 0]
    lse = jnp.log(jnp.sum(jnp.exp(pred + EPS), axis=1))
    return jnp.mean(-picked + lse)


if __name__ == "__main__":
    key = jax.random.PRNGKey(0)
    k1, k2, k3, k4 = jax.random.split(key, 4)

    # Case 1: small, evenly-tiled shapes.
    N, M = 16, 32
    pred = jax.random.normal(k1, (N, M), dtype=jnp.float32)
    target = jax.random.randint(k2, (N,), 0, M, dtype=jnp.int32)
    loss = jax.block_until_ready(ce_loss(pred, target))
    ref = ce_loss_ref(pred, target)
    assert jnp.allclose(loss, ref, atol=1e-5, rtol=1e-5), (loss, ref)

    # Case 2: ragged N (row masking) + M chunking (online LSE over 2 chunks).
    N2, M2 = 13, 256
    pred2 = jax.random.normal(k3, (N2, M2), dtype=jnp.float32)
    target2 = jax.random.randint(k4, (N2,), 0, M2, dtype=jnp.int32)
    loss2 = jax.block_until_ready(ce_loss(pred2, target2, tile_m=128))
    ref2 = ce_loss_ref(pred2, target2)
    assert jnp.allclose(loss2, ref2, atol=1e-5, rtol=1e-5), (loss2, ref2)

    print("KERNEL_OK")
</pallas_src>

<mosaic_0001>
module attributes {stable_mosaic.version = 11 : i64} {
  func.func @_ce_loss_kernel(%arg0: i32, %arg1: i32, %arg2: memref<16x32xf32, #tpu.memory_space<vmem>>, %arg3: memref<16x1xi32, #tpu.memory_space<vmem>>, %arg4: memref<16x1xf32, #tpu.memory_space<vmem>>, %arg5: memref<16x1xf32, #tpu.memory_space<vmem>>, %arg6: memref<16x1xf32, #tpu.memory_space<vmem>>) attributes {dimension_semantics = [#tpu.dimension_semantics<parallel>, #tpu.dimension_semantics<arbitrary>], iteration_bounds = array<i64: 1, 1>, scalar_prefetch = 0 : i64, scratch_operands = 2 : i64, tpu.core_type = #tpu.core_type<tc>, window_params = [{transform_indices = @transform_0, window_bounds = array<i64: 16, 32>}, {transform_indices = @transform_1, window_bounds = array<i64: 16, 1>}, {transform_indices = @transform_2, window_bounds = array<i64: 16, 1>}]} {
    %c0_i32 = arith.constant 0 : i32
    %0 = arith.cmpi eq, %arg1, %c0_i32 : i32
    %1 = arith.extui %0 : i1 to i32
    %c0_i32_0 = arith.constant 0 : i32
    %2 = arith.cmpi ne, %1, %c0_i32_0 : i32
    scf.if %2 {
      %cst_16 = arith.constant 0.000000e+00 : f32
      %27 = vector.broadcast %cst_16 : f32 to vector<16x1xf32>
      %c0_17 = arith.constant 0 : index
      %c0_18 = arith.constant 0 : index
      %28 = vector.load %arg5[%c0_17, %c0_18] : memref<16x1xf32, #tpu.memory_space<vmem>>, vector<16x1xf32>
      tpu.vector_store %arg5[%c0_17, %c0_18], %27 {strides = array<i32>} : memref<16x1xf32, #tpu.memory_space<vmem>>, vector<16x1xf32>,
      %cst_19 = arith.constant 0.000000e+00 : f32
      %29 = vector.broadcast %cst_19 : f32 to vector<16x1xf32>
      %c0_20 = arith.constant 0 : index
      %c0_21 = arith.constant 0 : index
      %30 = vector.load %arg6[%c0_20, %c0_21] : memref<16x1xf32, #tpu.memory_space<vmem>>, vector<16x1xf32>
      tpu.vector_store %arg6[%c0_20, %c0_21], %29 {strides = array<i32>} : memref<16x1xf32, #tpu.memory_space<vmem>>, vector<16x1xf32>,
    } else {
    }
    %c0 = arith.constant 0 : index
    %c0_1 = arith.constant 0 : index
    %3 = vector.load %arg2[%c0, %c0_1] : memref<16x32xf32, #tpu.memory_space<vmem>>, vector<16x32xf32>
    %c0_2 = arith.constant 0 : index
    %c0_3 = arith.constant 0 : index
    %4 = vector.load %arg3[%c0_2, %c0_3] : memref<16x1xi32, #tpu.memory_space<vmem>>, vector<16x1xi32>
    %5 = tpu.iota {dimensions = array<i32: 1>} : vector<16x32xi32>
    %c32_i32 = arith.constant 32 : i32
    %6 = arith.muli %arg1, %c32_i32 : i32
    %7 = vector.broadcast %6 : i32 to vector<16x32xi32>
    %8 = arith.addi %5, %7 : vector<16x32xi32>
    %9 = vector.broadcast %4 : vector<16x1xi32> to vector<16x32xi32>
    %10 = arith.cmpi eq, %8, %9 : vector<16x32xi32>
    %cst = arith.constant 0.000000e+00 : f32
    %11 = vector.broadcast %cst : f32 to vector<16x32xf32>
    %12 = arith.select %10, %3, %11 : vector<16x32xi1>, vector<16x32xf32>
    %c0_4 = arith.constant 0 : index
    %c0_5 = arith.constant 0 : index
    %13 = vector.load %arg6[%c0_4, %c0_5] : memref<16x1xf32, #tpu.memory_space<vmem>>, vector<16x1xf32>
    %cst_6 = arith.constant dense<0.000000e+00> : vector<16xf32>
    %14 = vector.multi_reduction <add>, %12, %cst_6 [1] : vector<16x32xf32> to vector<16xf32>
    %15 = vector.shape_cast %14 : vector<16xf32> to vector<16x1xf32>
    %16 = arith.addf %13, %15 : vector<16x1xf32>
    %c0_7 = arith.constant 0 : index
    %c0_8 = arith.constant 0 : index
    %17 = vector.load %arg6[%c0_7, %c0_8] : memref<16x1xf32, #tpu.memory_space<vmem>>, vector<16x1xf32>
    tpu.vector_store %arg6[%c0_7, %c0_8], %16 {strides = array<i32>} : memref<16x1xf32, #tpu.memory_space<vmem>>, vector<16x1xf32>,
    %18 = math.exp %3 : vector<16x32xf32>
    %c0_9 = arith.constant 0 : index
    %c0_10 = arith.constant 0 : index
    %19 = vector.load %arg5[%c0_9, %c0_10] : memref<16x1xf32, #tpu.memory_space<vmem>>, vector<16x1xf32>
    %cst_11 = arith.constant dense<0.000000e+00> : vector<16xf32>
    %20 = vector.multi_reduction <add>, %18, %cst_11 [1] : vector<16x32xf32> to vector<16xf32>
    %21 = vector.shape_cast %20 : vector<16xf32> to vector<16x1xf32>
    %22 = arith.addf %19, %21 : vector<16x1xf32>
    %c0_12 = arith.constant 0 : index
    %c0_13 = arith.constant 0 : index
    %23 = vector.load %arg5[%c0_12, %c0_13] : memref<16x1xf32, #tpu.memory_space<vmem>>, vector<16x1xf32>
    tpu.vector_store %arg5[%c0_12, %c0_13], %22 {strides = array<i32>} : memref<16x1xf32, #tpu.memory_space<vmem>>, vector<16x1xf32>,
    %c0_i32_14 = arith.constant 0 : i32
    %24 = arith.cmpi eq, %arg1, %c0_i32_14 : i32
    %25 = arith.extui %24 : i1 to i32
    %c0_i32_15 = arith.constant 0 : i32
    %26 = arith.cmpi ne, %25, %c0_i32_15 : i32
    scf.if %26 {
      %c0_16 = arith.constant 0 : index
      %c0_17 = arith.constant 0 : index
      %27 = vector.load %arg6[%c0_16, %c0_17] : memref<16x1xf32, #tpu.memory_space<vmem>>, vector<16x1xf32>
      %cst_18 = arith.constant 0.000000e+00 : f32
      %28 = vector.broadcast %cst_18 : f32 to vector<16x1xf32>
      %29 = arith.subf %28, %27 : vector<16x1xf32>
      %c0_19 = arith.constant 0 : index
      %c0_20 = arith.constant 0 : index
      %30 = vector.load %arg5[%c0_19, %c0_20] : memref<16x1xf32, #tpu.memory_space<vmem>>, vector<16x1xf32>
      %31 = math.log %30 : vector<16x1xf32>
      %32 = arith.addf %29, %31 : vector<16x1xf32>
      %c0_21 = arith.constant 0 : index
      %c0_22 = arith.constant 0 : index
      %33 = vector.load %arg4[%c0_21, %c0_22] : memref<16x1xf32, #tpu.memory_space<vmem>>, vector<16x1xf32>
      tpu.vector_store %arg4[%c0_21, %c0_22], %32 {strides = array<i32>} : memref<16x1xf32, #tpu.memory_space<vmem>>, vector<16x1xf32>,
    } else {
    }
    return
  }
  func.func @transform_0(%arg0: i32, %arg1: i32) -> (i32, i32) {
    %c0_i32 = arith.constant 0 : i32
    return %arg0, %arg1 : i32, i32
  }
  func.func @transform_1(%arg0: i32, %arg1: i32) -> (i32, i32) {
    %c0_i32 = arith.constant 0 : i32
    %c0_i32_0 = arith.constant 0 : i32
    return %arg0, %c0_i32 : i32, i32
  }
  func.func @transform_2(%arg0: i32, %arg1: i32) -> (i32, i32) {
    %c0_i32 = arith.constant 0 : i32
    %c0_i32_0 = arith.constant 0 : i32
    return %arg0, %c0_i32 : i32, i32
  }
}

</mosaic_0001>

<bundles_post_ra>
// kernel: tpu_custom_call.1
= control target key start
LH: loop header
LB: loop body
LE: loop exit
PB: predicated region body
PF: predicated region fallthrough
CT: control target
= control target key end

     0   :  { %v101_v0 = vmov 0   ;;  %vm15_vm0 = vcmask 7168   ;;  %v102_v7 = vmov 0.0   ;;  %vm41_vm1 = vcmask 261120   ;;  %s150_s1 = inlined_call_operand.vmem [shape: s32[16,1], index: 1, kind: input, shape index: {}]   ;;  %s151_s0 = inlined_call_operand.vmem [shape: f32[16,32], index: 0, kind: input, shape index: {}]   ;;  %s152_s2 = inlined_call_operand.vmem [shape: f32[16,1], index: 2, kind: output, shape index: {}]  }
   0x1   :  { %92 = vset.pattern.permute.xlu0 %v101_v0  ;;  %v22_v1 = vld [vmem:[%s150_s1] sm:$0xff]  ;;  %v21_v4 = vld [vmem:[%s151_s0 + $0x8] sm:$0xff]  ;;  %16 = vst.msk [vmem:[#allocation2] sm:$0xff] %vm15_vm0, %v102_v7  ;;  %17 = vst.msk [vmem:[#allocation2 + $0x8] sm:$0xff] %vm15_vm0, %v102_v7  ;;  %v24_v12 = vlaneseq }
   0x2   :  { %v20_v2 = vld [vmem:[%s151_s0] sm:$0xff]  ;;  %30 = vperm.xlu0 %92, %v22_v1   ;;  %v23_v5 = vld [vmem:[%s150_s1 + $0x8] sm:$0xff]  ;;  %v55_v6 = vmul.f32 1.442695, %v21_v4  ;;  %18 = vst.msk [vmem:[#allocation3] sm:$0xff] %vm15_vm0, %v102_v7  ;;  %19 = vst.msk [vmem:[#allocation3 + $0x8] sm:$0xff] %vm15_vm0, %v102_v7 }
   0x3   :  { %v53_v3 = vmul.f32 1.442695, %v20_v2  ;;  %v25_v13 = vand.u32 127, %v24_v12 }
   0x5   :  { %93 = vpow2.f32 %v53_v3 }
   0x6   :  { %95 = vpow2.f32 %v55_v6  ;;  %33 = vperm.xlu0 %92, %v23_v5  }
   0x8   :  { %v57_v20 = vld [vmem:[#allocation2] sm:$0xff]  ;;  %v58_v23 = vld [vmem:[#allocation2 + $0x8] sm:$0xff] }
   0x9   :  { %v39_v28 = vld [vmem:[#allocation3] sm:$0xff]  ;;  %v40_v31 = vld [vmem:[#allocation3 + $0x8] sm:$0xff] }
   0xf   :  { %v94_v8 = vpop.eup %93 }
  0x10   :  { %v96_v9 = vpop.eup %95  ;;  %v59_v10 = vsel %vm41_vm1, %v94_v8, 0.0 }
  0x11   :  { %60 = vadd.xlane.f32.xlu1 %v59_v10  ;;  %v62_v11 = vsel %vm41_vm1, %v96_v9, 0.0 }
  0x15   :  { %63 = vadd.xlane.f32.xlu1 %v62_v11 }
  0x81   :  { %v31_v14 = vpop.permute.xlu0 %30 }
  0x82   :  { %vm35_vm2 = vcmp.eq.s32.totalorder %v25_v13, %v31_v14 }
  0x83   :  { %v37_v15 = vsel %vm35_vm2, %v20_v2, 0.0 }
  0x84   :  { %v42_v16 = vsel %vm41_vm1, %v37_v15, 0.0 }
  0x85   :  { %v34_v17 = vpop.permute.xlu0 %33  ;;  %43 = vadd.xlane.f32.xlu0 %v42_v16 }
  0x86   :  { %vm36_vm3 = vcmp.eq.s32.totalorder %v25_v13, %v34_v17 }
  0x87   :  { %v38_v18 = vsel %vm36_vm3, %v21_v4, 0.0 }
  0x88   :  { %v45_v19 = vsel %vm41_vm1, %v38_v18, 0.0 }
  0x89   :  { %46 = vadd.xlane.f32.xlu1 %v45_v19 }
  0x9e   :  { %v61_v21 = vpop.xlane.xlu1 %60 }
  0x9f   :  { %v65_v22 = vadd.f32 %v61_v21, %v57_v20 }
  0xa1   :  { %67 = vst.msk [vmem:[#allocation2] sm:$0xff] %vm15_vm0, %v65_v22 }
  0xa2   :  { %v64_v24 = vpop.xlane.xlu1 %63 }
  0xa3   :  { %v66_v25 = vadd.f32 %v64_v24, %v58_v23 }
  0xa5   :  { %68 = vst.msk [vmem:[#allocation2 + $0x8] sm:$0xff] %vm15_vm0, %v66_v25 }
  0xa8   :  { %v76_v26 = vld [vmem:[#allocation2] sm:$0xff] }
  0xa9   :  { %97 = vlog2.f32 %v76_v26 }
  0xac   :  { %v77_v27 = vld [vmem:[#allocation2 + $0x8] sm:$0xff] }
  0xad   :  { %99 = vlog2.f32 %v77_v27 }
  0xb3   :  { %v98_v34 = vpop.eup %97 }
  0xb4   :  { %v79_v35 = vmul.f32 0.6931472, %v98_v34 }
  0xb7   :  { %v100_v36 = vpop.eup %99 }
  0xb8   :  { %v81_v39 = vmul.f32 0.6931472, %v100_v36 }
 0x112   :  { %v44_v29 = vpop.xlane.xlu0 %43 }
 0x113   :  { %v48_v30 = vadd.f32 %v44_v29, %v39_v28 }
 0x115   :  { %51 = vst.msk [vmem:[#allocation3] sm:$0xff] %vm15_vm0, %v48_v30 }
 0x116   :  { %v47_v32 = vpop.xlane.xlu1 %46 }
 0x117   :  { %v49_v33 = vadd.f32 %v47_v32, %v40_v31 }
 0x119   :  { %52 = vst.msk [vmem:[#allocation3 + $0x8] sm:$0xff] %vm15_vm0, %v49_v33 }
 0x11c   :  { %v72_v37 = vld [vmem:[#allocation3] sm:$0xff] }
 0x11d   :  { %v74_v38 = vsub.f32 0.0, %v72_v37 }
 0x11f   :  { %v82_v40 = vadd.f32 %v79_v35, %v74_v38 }
 0x120   :  { %v73_v41 = vld [vmem:[#allocation3 + $0x8] sm:$0xff] }
 0x121   :  { %84 = vst.msk [vmem:[%s152_s2] sm:$0xff] %vm15_vm0, %v82_v40  ;;  %v75_v42 = vsub.f32 0.0, %v73_v41 }
 0x123   :  { %v83_v43 = vadd.f32 %v81_v39, %v75_v42 }
 0x125   :  { %85 = vst.msk [vmem:[%s152_s2 + $0x8] sm:$0xff] %vm15_vm0, %v83_v43 }

</bundles_post_ra>
